<compile_context>
chip_gen: v7x
topology: tpu7x:2x2x1
jax: 0.10.0
libtpu: 0.0.40
codegen_flags: <defaults>
</compile_context>

<pallas_src>
import math

import jax
import jax.numpy as jnp
from jax.experimental import pallas as pl
from jax.experimental.pallas import tpu as pltpu


def get_scale_table(min_=0.11, max_=256.0, levels=64):
    """JAX port of lossyless.rates.get_scale_table (deterministic)."""
    return jnp.exp(jnp.linspace(math.log(min_), math.log(max_), levels))


_LOG2_INV = 1.0 / math.log(2.0)
_INV_SQRT2 = 1.0 / math.sqrt(2.0)
_LIKELIHOOD_EPS = 1e-9                    # compressai likelihood lower bound
_SCALE_LB = 0.11                          # == min(get_scale_table())
# Numerical-Recipes erfcc constant with ln(2) folded in so _half_erfc_pos
# returns 0.5*erfc(x) directly (saves a full-tile multiply).
_NR_C0 = -1.26551223 - math.log(2.0)


def _fast_recip(x):
    """1/x via EUP approximate reciprocal + one Newton step (kernel only).

    The Newton refinement costs 2 mul + 1 sub on the VALU but restores
    ~f32-level accuracy; needed because the CDF-difference cancellation at
    large scales amplifies relative errors by up to ~300x.
    """
    y = pl.reciprocal(x, approx=True)
    return y * (2.0 - x * y)


def _half_erfc_pos(x, recip):
    """0.5 * erfc(x) for x >= 0 (NR Chebyshev fit, relative error < 1.2e-7).

    Branch-free (no abs / no select): callers guarantee x >= 0.  `recip` is
    `_fast_recip` inside the kernel and exact division in the JAX reference,
    so both share the identical, relative-accurate formulation.
    """
    t = recip(1.0 + 0.5 * x)
    poly = t * (1.00002368 + t * (0.37409196 + t * (0.09678418 + t * (
        -0.18628806 + t * (0.27886807 + t * (-1.13520398 + t * (
            1.48851587 + t * (-0.82215223 + t * 0.17087277))))))))
    return t * jnp.exp(_NR_C0 + poly - x * x)


def _make_rate_kernel(z_valid, z_padded):
    needs_mask = z_padded != z_valid

    def rate_kernel(z_ref, mean_ref, scale_ref, zhat_ref, rate_ref):
        # Cast inside the kernel (inputs may be bf16); math stays f32.
        z = z_ref[...].astype(jnp.float32)
        mean = mean_ref[...].astype(jnp.float32)
        scale = jnp.maximum(scale_ref[...].astype(jnp.float32), _SCALE_LB)

        # Quantize around the conditional mean, then de-quantize.
        q = jnp.round(z - mean)
        zhat_ref[...] = (q + mean).astype(zhat_ref.dtype)

        # Gaussian conditional likelihood of the quantized symbol.
        #   p = Phi((0.5-v)/s) - Phi((-0.5-v)/s),   v = |q| (non-neg integer)
        #     = 0.5*erfc(|v*c - 0.5*c|)*sign-fix - 0.5*erfc(v*c + 0.5*c)
        # with c = 1/(s*sqrt(2)).  Both erfc arguments are sign-known, so the
        # only data-dependent select is on v == 0.
        v = jnp.abs(q)
        c = _fast_recip(scale) * _INV_SQRT2
        hc = 0.5 * c
        vc = v * c
        u_tail = _half_erfc_pos(jnp.abs(vc - hc), _fast_recip)  # |(v-0.5)c|
        l_tail = _half_erfc_pos(vc + hc, _fast_recip)           # always > 0
        # v == 0: p = Phi(hc*sqrt2-ish) - Phi(-...) = 1 - 2*l_tail  (u == l)
        # v >= 1: p = u_tail - l_tail
        p = jnp.where(v < 0.5, 1.0 - (l_tail + l_tail), u_tail - l_tail)
        p = jnp.maximum(p, _LIKELIHOOD_EPS)

        logp = jnp.log(p)
        if needs_mask:
            # Zero out lane-padding columns (Z padded up to a multiple of 128
            # for lane-dense stores); the mask is a compile-time constant tile.
            lane = jax.lax.broadcasted_iota(jnp.int32, logp.shape, 1)
            logp = jnp.where(lane < z_valid, logp, 0.0)

        # Rate in bits/sample; -1/ln2 applied AFTER the lane reduction.
        rate_ref[...] = (-_LOG2_INV) * jnp.sum(logp, axis=-1, keepdims=True)

    return rate_kernel


def _vmem_budgets():
    """(pipeline-buffer budget, vmem_limit_bytes), gated on chip VMEM size."""
    try:
        cap = pltpu.get_tpu_info().vmem_capacity_bytes
    except Exception:
        cap = 64 * 1024 * 1024                       # conservative fallback
    if cap >= 96 * 1024 * 1024:                      # v5e / v6e (128 MiB)
        return 24 * 1024 * 1024, 56 * 1024 * 1024
    return 12 * 1024 * 1024, 32 * 1024 * 1024        # v7x (64 MiB physical)


def _choose_batch_tile(B, Zp, bytes_per_elem, budget_bytes):
    """Largest batch tile (multiple of 8) whose double-buffered pipeline
    buffers fit the per-chip budget, capped at ceil(B/2) so the parallel grid
    axis has >= 2 steps (both v7x TensorCores; ~0.35us extra elsewhere)."""
    if B <= 8:
        return B                                     # full-dim block, grid=(1,)
    per_row = 2 * (Zp * bytes_per_elem + 4)          # 2 buffers * (rows + rate)
    tb = int(budget_bytes // per_row)
    tb = min(tb, (B + 1) // 2)
    tb = max(8, tb - tb % 8)
    return tb


def rate_estimator_forward(z, p_Zlx_mean, p_Zlx_scale):
    """Forward pass of the RateEstimator (Gaussian-conditional).

    z, p_Zlx_mean, p_Zlx_scale : [B, z_dim] (f32 or bf16)
    Returns (z_hat [B, z_dim] in z.dtype, rates [B] f32, logs, other).
    """
    B, Z = z.shape
    Zp = -(-Z // 128) * 128                          # lane-dense padding

    if Zp != Z:
        pad = ((0, 0), (0, Zp - Z))
        z_in = jnp.pad(z, pad)
        mean_in = jnp.pad(p_Zlx_mean, pad)
        scale_in = jnp.pad(p_Zlx_scale, pad, constant_values=1.0)
    else:
        z_in, mean_in, scale_in = z, p_Zlx_mean, p_Zlx_scale

    bytes_per_elem = (z.dtype.itemsize + p_Zlx_mean.dtype.itemsize
                      + p_Zlx_scale.dtype.itemsize + z.dtype.itemsize)
    budget, vmem_limit = _vmem_budgets()
    tb = _choose_batch_tile(B, Zp, bytes_per_elem, budget)
    grid = (pl.cdiv(B, tb),)

    kernel = _make_rate_kernel(Z, Zp)

    z_hat_p, rates_col = pl.pallas_call(
        kernel,
        out_shape=(
            jax.ShapeDtypeStruct((B, Zp), z.dtype),
            jax.ShapeDtypeStruct((B, 1), jnp.float32),
        ),
        grid=grid,
        in_specs=[
            pl.BlockSpec((tb, Zp), lambda i: (i, 0)),
            pl.BlockSpec((tb, Zp), lambda i: (i, 0)),
            pl.BlockSpec((tb, Zp), lambda i: (i, 0)),
        ],
        out_specs=(
            pl.BlockSpec((tb, Zp), lambda i: (i, 0)),
            pl.BlockSpec((tb, 1), lambda i: (i, 0)),
        ),
        compiler_params=pltpu.CompilerParams(
            dimension_semantics=("parallel",),       # megacore sharding on v7x
            vmem_limit_bytes=vmem_limit,
        ),
    )(z_in, mean_in, scale_in)

    z_hat = z_hat_p[:, :Z] if Zp != Z else z_hat_p
    rates = rates_col[:, 0]
    logs = {"rate": jnp.mean(rates)}
    other = {}
    return z_hat, rates, logs, other


def _reference_forward(z, mean, scale):
    """Plain-JAX reference (same stable formulation, exact divides)."""
    z = z.astype(jnp.float32)
    mean = mean.astype(jnp.float32)
    scale = jnp.maximum(scale.astype(jnp.float32), _SCALE_LB)
    q = jnp.round(z - mean)
    z_hat = q + mean
    v = jnp.abs(q)
    exact_recip = lambda a: 1.0 / a
    c = exact_recip(scale) * _INV_SQRT2
    hc = 0.5 * c
    vc = v * c
    u_tail = _half_erfc_pos(jnp.abs(vc - hc), exact_recip)
    l_tail = _half_erfc_pos(vc + hc, exact_recip)
    p = jnp.where(v < 0.5, 1.0 - 2.0 * l_tail, u_tail - l_tail)
    p = jnp.maximum(p, _LIKELIHOOD_EPS)
    rates = -jnp.sum(jnp.log(p), axis=-1) * _LOG2_INV
    return z_hat, rates


def _make_inputs(key, B, Z, dtype=jnp.float32):
    k_z, k_mu, k_sc = jax.random.split(key, 3)
    z = (jax.random.normal(k_z, (B, Z), dtype=jnp.float32) * 3.0).astype(dtype)
    mu = jax.random.normal(k_mu, (B, Z), dtype=jnp.float32).astype(dtype)
    sc = jax.nn.softplus(
        jax.random.normal(k_sc, (B, Z), dtype=jnp.float32)).astype(dtype)
    return z, mu, sc


if __name__ == "__main__":
    key = jax.random.PRNGKey(0)
    k0, k1, k2 = jax.random.split(key, 3)

    # --- main check: lane-dense Z, two grid steps (exercises megacore path)
    B, Z_DIM = 16, 128
    z, mu, sc = _make_inputs(k0, B, Z_DIM, jnp.float32)
    z_hat, rates, logs, other = rate_estimator_forward(z, mu, sc)
    jax.block_until_ready((z_hat, rates))

    z_hat_ref, rates_ref = _reference_forward(z, mu, sc)
    assert z_hat.shape == (B, Z_DIM) and rates.shape == (B,)
    assert bool(jnp.all(jnp.isfinite(rates)))
    assert jnp.allclose(z_hat, z_hat_ref, atol=1e-5, rtol=1e-5)
    assert jnp.allclose(rates, rates_ref, atol=1e-3, rtol=1e-3)

    # --- padded-Z / ragged-B check (Z=96 padded to 128, B=12 over 8-row tiles)
    B2, Z2 = 12, 96
    z2, mu2, sc2 = _make_inputs(k1, B2, Z2, jnp.float32)
    z_hat2, rates2, _, _ = rate_estimator_forward(z2, mu2, sc2)
    jax.block_until_ready((z_hat2, rates2))
    z_hat2_ref, rates2_ref = _reference_forward(z2, mu2, sc2)
    assert z_hat2.shape == (B2, Z2) and rates2.shape == (B2,)
    assert jnp.allclose(z_hat2, z_hat2_ref, atol=1e-5, rtol=1e-5)
    assert jnp.allclose(rates2, rates2_ref, atol=1e-3, rtol=1e-3)

    # --- bf16 I/O smoke test (halves HBM traffic; kernel casts internally)
    z3, mu3, sc3 = _make_inputs(k2, B, Z_DIM, jnp.bfloat16)
    z_hat3, rates3, _, _ = rate_estimator_forward(z3, mu3, sc3)
    jax.block_until_ready((z_hat3, rates3))
    assert z_hat3.dtype == jnp.bfloat16 and z_hat3.shape == (B, Z_DIM)
    assert rates3.shape == (B,) and bool(jnp.all(jnp.isfinite(rates3)))

    print("KERNEL_OK")
</pallas_src>

<mosaic_0001>
module attributes {stable_mosaic.version = 11 : i64} {
  func.func @rate_kernel(%arg0: i32, %arg1: memref<8x128xf32, #tpu.memory_space<vmem>>, %arg2: memref<8x128xf32, #tpu.memory_space<vmem>>, %arg3: memref<8x128xf32, #tpu.memory_space<vmem>>, %arg4: memref<8x128xf32, #tpu.memory_space<vmem>>, %arg5: memref<8x1xf32, #tpu.memory_space<vmem>>) attributes {dimension_semantics = [#tpu.dimension_semantics<parallel>], iteration_bounds = array<i64: 2>, scalar_prefetch = 0 : i64, scratch_operands = 0 : i64, tpu.core_type = #tpu.core_type<tc>, window_params = [{transform_indices = @transform_0, window_bounds = array<i64: 8, 128>}, {transform_indices = @transform_1, window_bounds = array<i64: 8, 128>}, {transform_indices = @transform_2, window_bounds = array<i64: 8, 128>}, {transform_indices = @transform_3, window_bounds = array<i64: 8, 128>}, {transform_indices = @transform_4, window_bounds = array<i64: 8, 1>}]} {
    %c0 = arith.constant 0 : index
    %c0_0 = arith.constant 0 : index
    %0 = vector.load %arg1[%c0, %c0_0] : memref<8x128xf32, #tpu.memory_space<vmem>>, vector<8x128xf32>
    %c0_1 = arith.constant 0 : index
    %c0_2 = arith.constant 0 : index
    %1 = vector.load %arg2[%c0_1, %c0_2] : memref<8x128xf32, #tpu.memory_space<vmem>>, vector<8x128xf32>
    %c0_3 = arith.constant 0 : index
    %c0_4 = arith.constant 0 : index
    %2 = vector.load %arg3[%c0_3, %c0_4] : memref<8x128xf32, #tpu.memory_space<vmem>>, vector<8x128xf32>
    %cst = arith.constant 1.100000e-01 : f32
    %3 = vector.broadcast %cst : f32 to vector<8x128xf32>
    %4 = arith.maximumf %2, %3 : vector<8x128xf32>
    %5 = arith.subf %0, %1 : vector<8x128xf32>
    %6 = math.roundeven %5 : vector<8x128xf32>
    %7 = arith.addf %6, %1 : vector<8x128xf32>
    %c0_5 = arith.constant 0 : index
    %c0_6 = arith.constant 0 : index
    %8 = vector.load %arg4[%c0_5, %c0_6] : memref<8x128xf32, #tpu.memory_space<vmem>>, vector<8x128xf32>
    tpu.vector_store %arg4[%c0_5, %c0_6], %7 {strides = array<i32>} : memref<8x128xf32, #tpu.memory_space<vmem>>, vector<8x128xf32>,
    %9 = math.absf %6 : vector<8x128xf32>
    %10 = tpu.reciprocal %4 {approx = true} : vector<8x128xf32> -> vector<8x128xf32>
    %11 = arith.mulf %4, %10 : vector<8x128xf32>
    %cst_7 = arith.constant 2.000000e+00 : f32
    %12 = vector.broadcast %cst_7 : f32 to vector<8x128xf32>
    %13 = arith.subf %12, %11 : vector<8x128xf32>
    %14 = arith.mulf %10, %13 : vector<8x128xf32>
    %cst_8 = arith.constant 0.707106769 : f32
    %15 = vector.broadcast %cst_8 : f32 to vector<8x128xf32>
    %16 = arith.mulf %14, %15 : vector<8x128xf32>
    %cst_9 = arith.constant 5.000000e-01 : f32
    %17 = vector.broadcast %cst_9 : f32 to vector<8x128xf32>
    %18 = arith.mulf %17, %16 : vector<8x128xf32>
    %19 = arith.mulf %9, %16 : vector<8x128xf32>
    %20 = arith.subf %19, %18 : vector<8x128xf32>
    %21 = math.absf %20 : vector<8x128xf32>
    %cst_10 = arith.constant 5.000000e-01 : f32
    %22 = vector.broadcast %cst_10 : f32 to vector<8x128xf32>
    %23 = arith.mulf %22, %21 : vector<8x128xf32>
    %cst_11 = arith.constant 1.000000e+00 : f32
    %24 = vector.broadcast %cst_11 : f32 to vector<8x128xf32>
    %25 = arith.addf %24, %23 : vector<8x128xf32>
    %26 = tpu.reciprocal %25 {approx = true} : vector<8x128xf32> -> vector<8x128xf32>
    %27 = arith.mulf %25, %26 : vector<8x128xf32>
    %cst_12 = arith.constant 2.000000e+00 : f32
    %28 = vector.broadcast %cst_12 : f32 to vector<8x128xf32>
    %29 = arith.subf %28, %27 : vector<8x128xf32>
    %30 = arith.mulf %26, %29 : vector<8x128xf32>
    %cst_13 = arith.constant 0.170872763 : f32
    %31 = vector.broadcast %cst_13 : f32 to vector<8x128xf32>
    %32 = arith.mulf %30, %31 : vector<8x128xf32>
    %cst_14 = arith.constant -0.822152256 : f32
    %33 = vector.broadcast %cst_14 : f32 to vector<8x128xf32>
    %34 = arith.addf %33, %32 : vector<8x128xf32>
    %35 = arith.mulf %30, %34 : vector<8x128xf32>
    %cst_15 = arith.constant 1.48851585 : f32
    %36 = vector.broadcast %cst_15 : f32 to vector<8x128xf32>
    %37 = arith.addf %36, %35 : vector<8x128xf32>
    %38 = arith.mulf %30, %37 : vector<8x128xf32>
    %cst_16 = arith.constant -1.13520396 : f32
    %39 = vector.broadcast %cst_16 : f32 to vector<8x128xf32>
    %40 = arith.addf %39, %38 : vector<8x128xf32>
    %41 = arith.mulf %30, %40 : vector<8x128xf32>
    %cst_17 = arith.constant 0.278868079 : f32
    %42 = vector.broadcast %cst_17 : f32 to vector<8x128xf32>
    %43 = arith.addf %42, %41 : vector<8x128xf32>
    %44 = arith.mulf %30, %43 : vector<8x128xf32>
    %cst_18 = arith.constant -0.186288059 : f32
    %45 = vector.broadcast %cst_18 : f32 to vector<8x128xf32>
    %46 = arith.addf %45, %44 : vector<8x128xf32>
    %47 = arith.mulf %30, %46 : vector<8x128xf32>
    %cst_19 = arith.constant 0.0967841818 : f32
    %48 = vector.broadcast %cst_19 : f32 to vector<8x128xf32>
    %49 = arith.addf %48, %47 : vector<8x128xf32>
    %50 = arith.mulf %30, %49 : vector<8x128xf32>
    %cst_20 = arith.constant 0.374091953 : f32
    %51 = vector.broadcast %cst_20 : f32 to vector<8x128xf32>
    %52 = arith.addf %51, %50 : vector<8x128xf32>
    %53 = arith.mulf %30, %52 : vector<8x128xf32>
    %cst_21 = arith.constant 1.00002372 : f32
    %54 = vector.broadcast %cst_21 : f32 to vector<8x128xf32>
    %55 = arith.addf %54, %53 : vector<8x128xf32>
    %56 = arith.mulf %30, %55 : vector<8x128xf32>
    %cst_22 = arith.constant -1.95865941 : f32
    %57 = vector.broadcast %cst_22 : f32 to vector<8x128xf32>
    %58 = arith.addf %57, %56 : vector<8x128xf32>
    %59 = arith.mulf %21, %21 : vector<8x128xf32>
    %60 = arith.subf %58, %59 : vector<8x128xf32>
    %61 = math.exp %60 : vector<8x128xf32>
    %62 = arith.mulf %30, %61 : vector<8x128xf32>
    %63 = arith.addf %19, %18 : vector<8x128xf32>
    %cst_23 = arith.constant 5.000000e-01 : f32
    %64 = vector.broadcast %cst_23 : f32 to vector<8x128xf32>
    %65 = arith.mulf %64, %63 : vector<8x128xf32>
    %cst_24 = arith.constant 1.000000e+00 : f32
    %66 = vector.broadcast %cst_24 : f32 to vector<8x128xf32>
    %67 = arith.addf %66, %65 : vector<8x128xf32>
    %68 = tpu.reciprocal %67 {approx = true} : vector<8x128xf32> -> vector<8x128xf32>
    %69 = arith.mulf %67, %68 : vector<8x128xf32>
    %cst_25 = arith.constant 2.000000e+00 : f32
    %70 = vector.broadcast %cst_25 : f32 to vector<8x128xf32>
    %71 = arith.subf %70, %69 : vector<8x128xf32>
    %72 = arith.mulf %68, %71 : vector<8x128xf32>
    %cst_26 = arith.constant 0.170872763 : f32
    %73 = vector.broadcast %cst_26 : f32 to vector<8x128xf32>
    %74 = arith.mulf %72, %73 : vector<8x128xf32>
    %cst_27 = arith.constant -0.822152256 : f32
    %75 = vector.broadcast %cst_27 : f32 to vector<8x128xf32>
    %76 = arith.addf %75, %74 : vector<8x128xf32>
    %77 = arith.mulf %72, %76 : vector<8x128xf32>
    %cst_28 = arith.constant 1.48851585 : f32
    %78 = vector.broadcast %cst_28 : f32 to vector<8x128xf32>
    %79 = arith.addf %78, %77 : vector<8x128xf32>
    %80 = arith.mulf %72, %79 : vector<8x128xf32>
    %cst_29 = arith.constant -1.13520396 : f32
    %81 = vector.broadcast %cst_29 : f32 to vector<8x128xf32>
    %82 = arith.addf %81, %80 : vector<8x128xf32>
    %83 = arith.mulf %72, %82 : vector<8x128xf32>
    %cst_30 = arith.constant 0.278868079 : f32
    %84 = vector.broadcast %cst_30 : f32 to vector<8x128xf32>
    %85 = arith.addf %84, %83 : vector<8x128xf32>
    %86 = arith.mulf %72, %85 : vector<8x128xf32>
    %cst_31 = arith.constant -0.186288059 : f32
    %87 = vector.broadcast %cst_31 : f32 to vector<8x128xf32>
    %88 = arith.addf %87, %86 : vector<8x128xf32>
    %89 = arith.mulf %72, %88 : vector<8x128xf32>
    %cst_32 = arith.constant 0.0967841818 : f32
    %90 = vector.broadcast %cst_32 : f32 to vector<8x128xf32>
    %91 = arith.addf %90, %89 : vector<8x128xf32>
    %92 = arith.mulf %72, %91 : vector<8x128xf32>
    %cst_33 = arith.constant 0.374091953 : f32
    %93 = vector.broadcast %cst_33 : f32 to vector<8x128xf32>
    %94 = arith.addf %93, %92 : vector<8x128xf32>
    %95 = arith.mulf %72, %94 : vector<8x128xf32>
    %cst_34 = arith.constant 1.00002372 : f32
    %96 = vector.broadcast %cst_34 : f32 to vector<8x128xf32>
    %97 = arith.addf %96, %95 : vector<8x128xf32>
    %98 = arith.mulf %72, %97 : vector<8x128xf32>
    %cst_35 = arith.constant -1.95865941 : f32
    %99 = vector.broadcast %cst_35 : f32 to vector<8x128xf32>
    %100 = arith.addf %99, %98 : vector<8x128xf32>
    %101 = arith.mulf %63, %63 : vector<8x128xf32>
    %102 = arith.subf %100, %101 : vector<8x128xf32>
    %103 = math.exp %102 : vector<8x128xf32>
    %104 = arith.mulf %72, %103 : vector<8x128xf32>
    %cst_36 = arith.constant 5.000000e-01 : f32
    %105 = vector.broadcast %cst_36 : f32 to vector<8x128xf32>
    %106 = arith.cmpf olt, %9, %105 : vector<8x128xf32>
    %107 = arith.addf %104, %104 : vector<8x128xf32>
    %cst_37 = arith.constant 1.000000e+00 : f32
    %108 = vector.broadcast %cst_37 : f32 to vector<8x128xf32>
    %109 = arith.subf %108, %107 : vector<8x128xf32>
    %110 = arith.subf %62, %104 : vector<8x128xf32>
    %111 = arith.select %106, %109, %110 : vector<8x128xi1>, vector<8x128xf32>
    %cst_38 = arith.constant 9.99999971E-10 : f32
    %112 = vector.broadcast %cst_38 : f32 to vector<8x128xf32>
    %113 = arith.maximumf %111, %112 : vector<8x128xf32>
    %114 = math.log %113 : vector<8x128xf32>
    %cst_39 = arith.constant dense<0.000000e+00> : vector<8xf32>
    %115 = vector.multi_reduction <add>, %114, %cst_39 [1] : vector<8x128xf32> to vector<8xf32>
    %116 = vector.shape_cast %115 : vector<8xf32> to vector<8x1xf32>
    %cst_40 = arith.constant -1.44269502 : f32
    %117 = vector.broadcast %cst_40 : f32 to vector<8x1xf32>
    %118 = arith.mulf %117, %116 : vector<8x1xf32>
    %c0_41 = arith.constant 0 : index
    %c0_42 = arith.constant 0 : index
    %119 = vector.load %arg5[%c0_41, %c0_42] : memref<8x1xf32, #tpu.memory_space<vmem>>, vector<8x1xf32>
    tpu.vector_store %arg5[%c0_41, %c0_42], %118 {strides = array<i32>} : memref<8x1xf32, #tpu.memory_space<vmem>>, vector<8x1xf32>,
    return
  }
  func.func @transform_0(%arg0: i32) -> (i32, i32) {
    %c0_i32 = arith.constant 0 : i32
    %c0_i32_0 = arith.constant 0 : i32
    return %arg0, %c0_i32 : i32, i32
  }
  func.func @transform_1(%arg0: i32) -> (i32, i32) {
    %c0_i32 = arith.constant 0 : i32
    %c0_i32_0 = arith.constant 0 : i32
    return %arg0, %c0_i32 : i32, i32
  }
  func.func @transform_2(%arg0: i32) -> (i32, i32) {
    %c0_i32 = arith.constant 0 : i32
    %c0_i32_0 = arith.constant 0 : i32
    return %arg0, %c0_i32 : i32, i32
  }
  func.func @transform_3(%arg0: i32) -> (i32, i32) {
    %c0_i32 = arith.constant 0 : i32
    %c0_i32_0 = arith.constant 0 : i32
    return %arg0, %c0_i32 : i32, i32
  }
  func.func @transform_4(%arg0: i32) -> (i32, i32) {
    %c0_i32 = arith.constant 0 : i32
    %c0_i32_0 = arith.constant 0 : i32
    return %arg0, %c0_i32 : i32, i32
  }
}

</mosaic_0001>

<bundles_post_ra>
// kernel: tpu_custom_call.1
= control target key start
LH: loop header
LB: loop body
LE: loop exit
PB: predicated region body
PF: predicated region fallthrough
CT: control target
= control target key end

     0   :  { %s1068_s0 = inlined_call_operand.hbm [shape: f32[16,128], index: 0, kind: input, shape index: {}]   ;;  %s1069_s1 = inlined_call_operand.hbm [shape: f32[16,128], index: 1, kind: input, shape index: {}]   ;;  %s1070_s2 = inlined_call_operand.hbm [shape: f32[16,128], index: 2, kind: input, shape index: {}]   ;;  %s1071_s3 = inlined_call_operand.hbm [shape: f32[16,128], index: 3, kind: output, shape index: {0}]   ;;  %s1072_s4 = inlined_call_operand.vmem [shape: f32[16,1], index: 4, kind: output, shape index: {1}]  }
   0x1   :  { %1077 = sst [smem:[#allocation13_spill]] %s1069_s1 }
   0x2   :  { %10 = vsyncpa [#allocation3], 0 }
   0x3   :  { %12 = vsyncpa [#allocation3 + $0x1], 0 }
   0x4   :  { %13 = vsyncpa [#allocation6], 0 }
   0x5   :  { %15 = vsyncpa [#allocation6 + $0x1], 0 }
   0x6   :  { %16 = vsyncpa [#allocation4], 0 }
   0x7   :  { %18 = vsyncpa [#allocation4 + $0x1], 0  ;;  %s822_s15 = smov 0   ;;  %s824_s16 = smov 0  }
   0x8   :  { %s826_s17 = smov 0   ;;  %s828_s18 = smov 0  }
   0x9 LB: > { %s843_s19 = sadd.s32 4294967295, %s791_s18   ;;  %s543_s20 = sadd.s32 4294967294, %s791_s18   ;;  %s791_s18 = sphi %s828_s18, %s1098_s18   ;;  %s787_s17 = sphi %s826_s17, %s1097_s17   ;;  %s783_s16 = sphi %s824_s16, %s1096_s16   ;;  %s779_s15 = sphi %s822_s15, %s1095_s15  }
   0xa   : > { %s847_s21 = sadd.s32 1, %s791_s18   ;;  %s31_s22 = sadd.s32 1, %s787_s17 }
   0xb   : > { %s28_s23 = ssub.s32 %s791_s18, %s847_s21  ;;  %p38_p0 = scmp.ne.s32.totalorder %s787_s17, %s783_s16 }
   0xc   : > { %p29_p1 = scmp.eq.s32.totalorder %s28_s23, 0  ;;  %p39_p2 = scmp.eq.s32.totalorder %s791_s18, 0 }
   0xd   : > { %p44_p3 = scmp.ne.s32.totalorder %s783_s16, %s779_s15  ;;  %p45_p4 = scmp.eq.s32.totalorder %s843_s19, 0 }
   0xe   : > { %s859_s24 = scalar_select %p29_p1, %s787_s17, %s31_s22  }
   0xf   : > { %p40_p5 = por %p39_p2, %p38_p0  ;;  %p861_p6 = por %p45_p4, %p44_p3 }
  0x10   : > { %1078 = sst [smem:[#allocation12_spill]] %s859_s24  ;;  %p120_p7 = scmp.eq.s32.totalorder %s843_s19, 1 }
  0x11   : > { %s1079_s25 = scalar_select %p861_p6, 1, 0 }
  0x12   : > { %p126_p8 = scmp.eq.s32.totalorder %s543_s20, 1  ;;  %p585_p10 = scmp.lt.s32.totalorder %s791_s18, 2 }
  0x13   : > { %p868_p11 = por %p120_p7, %p38_p0  ;;  %s172_s28 = sand.u32 1, %s787_s17  }
  0x14   : > { %p872_p12 = por %p126_p8, %p44_p3  ;;  %s878_s29 = sshll.u32 %s791_s18, 7 }
  0x15   : > { %s1080_s26 = scalar_select %p868_p11, 1, 0 }
  0x16   : > { %s1081_s27 = scalar_select %p872_p12, 1, 0 }
  0x17   : > { %s882_s30 = sshll.u32 %s172_s28, 3  ;;  %p884_p13 = pnand %p585_p10, %p40_p5 }
  0x18   : > { %s190_s6 = sand.u32 1, %s791_s18   ;;  %s1083_s1 = sld [smem:[#allocation13_spill]] }
  0x19   : > { %s1082_s5 = scalar_select %p884_p13, 1, 0 }
  0x1a   : > { %s194_s10 = scalar_lea.vmem [#allocation5], %s882_s30  ;;  %s899_s12 = scalar_lea.sflag [#allocation6], %s190_s6 }
  0x1b   : > { %s201_s11 = sshll.u32 %s194_s10, 4  ;;  %p905_p2 = pneg %p884_p13  ;;  %s896_s11 = int_to_ptr.vmem [resolvable:$true] %s201_s11 }
  0x1e   : > { %s893_s9 = scalar_lea.hbm %s1083_s1, %s878_s29  ;;  %s636_s23 = scalar_lea.hbm %s1083_s1, 256 }
  0x1f   : > { %s631_s13 = scalar_lea.hbm %s893_s9, 128  ;;  %p637_p5 = scmp.lt.u32.totalorder %s893_s9, %s1083_s1 }
  0x20   : > { %p632_p1 = scmp.ne.s32.totalorder %s893_s9, %s631_s13  ;;  %p638_p7 = scmp.lt.u32.totalorder %s636_s23, %s631_s13 }
  0x21   : > { %p640_p10 = scmp.lt.u32.totalorder %s631_s13, %s893_s9 }
  0x22   : > { %p634_p3 = pnand %p905_p2, %p632_p1  ;;  %p639_p8 = por %p638_p7, %p637_p5 }
  0x24   : > { %p635_p4 = pneg %p634_p3  ;;  %p641_p9 = por %p640_p10, %p639_p8 }
  0x26   : > { %p642_p0 = pnand %p641_p9, %p635_p4 }
  0x28   : > { %645 = shalt.err (!%p642_p0)
}
  0x29   : > { %s646_s6 = scalar_lea.vmem %s896_s11, 128  ;;  %s793_s10 = smov [#allocation5]  }
  0x2a   : > { %p647_p1 = scmp.ne.s32.totalorder %s896_s11, %s646_s6  ;;  %s651_s20 = sshll.u32 %s793_s10, 4  ;;  %s652_s20 = int_to_ptr.vmem [resolvable:$false] %s651_s20 }
  0x2b   : > { %s653_s22 = scalar_lea.vmem %s652_s20, 256  ;;  %p654_p11 = scmp.lt.s32.totalorder %s896_s11, %s652_s20 }
  0x2c   : > { %p649_p3 = pnand %p647_p1, %p905_p2  ;;  %p655_p6 = scmp.lt.s32.totalorder %s653_s22, %s646_s6 }
  0x2e   : > { %p650_p12 = pneg %p649_p3  ;;  %p656_p5 = por %p655_p6, %p654_p11 }
  0x30   : > { %p657_p7 = pnand %p656_p5, %p650_p12 }
  0x32   : > { %660 = shalt.err (!%p657_p7)
}
  0x33   : > { %577 = dma.hbm_to_vmem [thread:$0]  (!%p884_p13), %s893_s9, 128, %s896_s11, %s899_s12  }
  0x34   : > { %p224_p9 = scmp.lt.s32.totalorder %s791_s18, 3  ;;  %s934_s7 = scalar_lea.hbm %s1068_s0, %s878_s29 }
  0x35   : > { %p1085_p6 = scmp.ge.s32.totalorder %s791_s18, 1  ;;  %s176_s6 = scalar_lea.vmem [#allocation2], %s882_s30 }
  0x36   : > { %s183_s10 = sshll.u32 %s176_s6, 4  ;;  %s173_s9 = scalar_lea.sflag [#allocation3], %s172_s28  ;;  %s184_s10 = int_to_ptr.vmem [resolvable:$true] %s183_s10 }
  0x37   : > { %p938_p11 = pnand %p1085_p6, %p224_p9  ;;  %s661_s11 = scalar_lea.hbm %s934_s7, 128 }
  0x38   : > { %p662_p12 = scmp.ne.s32.totalorder %s934_s7, %s661_s11  ;;  %s666_s13 = scalar_lea.hbm %s1068_s0, 256 }
  0x39   : > { %s1086_s8 = scalar_select %p938_p11, 1, 0 }
  0x3a   : > { %p664_p0 = pnand %p662_p12, %p905_p2  ;;  %p667_p8 = scmp.lt.u32.totalorder %s934_s7, %s1068_s0 }
  0x3b   : > { %p668_p10 = scmp.lt.u32.totalorder %s666_s13, %s661_s11  ;;  %p670_p3 = scmp.lt.u32.totalorder %s661_s11, %s934_s7 }
  0x3c   : > { %p665_p4 = pneg %p664_p0 }
  0x3d   : > { %p669_p1 = por %p668_p10, %p667_p8 }
  0x3f   : > { %p671_p5 = por %p670_p3, %p669_p1 }
  0x41   : > { %p672_p7 = pnand %p671_p5, %p665_p4 }
  0x43   : > { %675 = shalt.err (!%p672_p7)
}
  0x44   : > { %s676_s28 = scalar_lea.vmem %s184_s10, 128  ;;  %s794_s6 = smov [#allocation2]  }
  0x45   : > { %p677_p9 = scmp.ne.s32.totalorder %s184_s10, %s676_s28  ;;  %s681_s24 = sshll.u32 %s794_s6, 4  ;;  %s682_s24 = int_to_ptr.vmem [resolvable:$false] %s681_s24 }
  0x46   : > { %s683_s20 = scalar_lea.vmem %s682_s24, 256  ;;  %p684_p0 = scmp.lt.s32.totalorder %s184_s10, %s682_s24 }
  0x47   : > { %p679_p6 = pnand %p677_p9, %p905_p2  ;;  %p685_p11 = scmp.lt.s32.totalorder %s683_s20, %s676_s28 }
  0x49   : > { %p680_p12 = pneg %p679_p6  ;;  %p686_p13 = por %p685_p11, %p684_p0 }
  0x4b   : > { %p687_p8 = pnand %p686_p13, %p680_p12 }
  0x4d   : > { %690 = shalt.err (!%p687_p8)
}
  0x4e   : > { %p1087_p10 = scmp.ne.s32.totalorder %s1082_s5, 0  ;;  %s966_s22 = scalar_lea.hbm %s1070_s2, %s878_s29 }
  0x4f   : > { %s212_s24 = scalar_lea.vmem [#allocation7], %s882_s30  ;;  %s691_s23 = scalar_lea.hbm %s966_s22, 128 }
  0x50   : > { %574 = dma.hbm_to_vmem [thread:$0]  (!%p1087_p10), %s934_s7, 128, %s184_s10, %s173_s9  }
  0x51   : > { %s219_s13 = sshll.u32 %s212_s24, 4  ;;  %p692_p13 = scmp.ne.s32.totalorder %s966_s22, %s691_s23  ;;  %s220_s13 = int_to_ptr.vmem [resolvable:$true] %s219_s13 }
  0x52   : > { %s696_s7 = scalar_lea.hbm %s1070_s2, 256  ;;  %p697_p1 = scmp.lt.u32.totalorder %s966_s22, %s1070_s2 }
  0x53   : > { %p694_p11 = pnand %p692_p13, %p905_p2  ;;  %p698_p3 = scmp.lt.u32.totalorder %s696_s7, %s691_s23 }
  0x54   : > { %p700_p7 = scmp.lt.u32.totalorder %s691_s23, %s966_s22 }
  0x55   : > { %p695_p4 = pneg %p694_p11  ;;  %p699_p5 = por %p698_p3, %p697_p1 }
  0x57   : > { %p701_p9 = por %p700_p7, %p699_p5 }
  0x59   : > { %p702_p6 = pnand %p701_p9, %p695_p4 }
  0x5b   : > { %705 = shalt.err (!%p702_p6)
}
  0x5c   : > { %s706_s29 = scalar_lea.vmem %s220_s13, 128  ;;  %s795_s30 = smov [#allocation7]  }
  0x5d   : > { %p707_p12 = scmp.ne.s32.totalorder %s220_s13, %s706_s29  ;;  %s711_s20 = sshll.u32 %s795_s30, 4  ;;  %s712_s20 = int_to_ptr.vmem [resolvable:$false] %s711_s20 }
  0x5e   : > { %s713_s1 = scalar_lea.vmem %s712_s20, 256  ;;  %p714_p13 = scmp.lt.s32.totalorder %s220_s13, %s712_s20 }
  0x5f   : > { %p709_p0 = pnand %p707_p12, %p905_p2  ;;  %p715_p11 = scmp.lt.s32.totalorder %s713_s1, %s706_s29 }
  0x61   : > { %p710_p8 = pneg %p709_p0  ;;  %p716_p10 = por %p715_p11, %p714_p13 }
  0x63   : > { %p717_p1 = pnand %p716_p10, %p710_p8 }
  0x65   : > { %720 = shalt.err (!%p717_p1)
}
  0x66   : > { %p1088_p3 = scmp.ne.s32.totalorder %s1082_s5, 0  ;;  %p1089_p4 = scmp.ne.s32.totalorder %s1086_s8, 0 }
  0x67   : > { %s990_s14 = sand.u32 (!%p1089_p4), 1, %s783_s16   ;;  %p1090_p2 = scmp.ne.s32.totalorder (!%p1089_p4), %s1079_s25, 0 }
  0x68   : > { %580 = dma.hbm_to_vmem [thread:$0]  (!%p1088_p3), %s966_s22, 128, %s220_s13, %s899_s12  }
  0x69   : > { %228 = sbr.rel (%p1089_p4) target bundleno = 382 (0x17e), region = 32  ;;  %s993_s11 = sshll.u32 (!%p1089_p4), %s990_s14, 3 }
  0x6a   : > { %s231_s24 = scalar_lea.sflag (!%p1089_p4), [#allocation3], %s990_s14  ;;  %s234_s23 = scalar_lea.vmem (!%p1089_p4), [#allocation2], %s993_s11 }
  0x70   : > { %766 = dma.done.wait (%p1090_p2), %s231_s24, 128  }
  0x71   : > { %768 = vsyncadd (%p1090_p2), %s231_s24, 4294967168  ;;  %s239_s5 = sand.u32 1, %s843_s19   ;;  %s243_s8 = scalar_lea.vmem [#allocation5], %s993_s11 }
  0x72   : > { %s240_s12 = scalar_lea.sflag [#allocation6], %s239_s5 }
  0x73   : > { %770 = dma.done.wait (%p1090_p2), %s240_s12, 256  }
  0x74   : > { %772 = vsyncadd (%p1090_p2), %s240_s12, 4294967040  ;;  %s252_s22 = scalar_lea.vmem [#allocation7], %s993_s11  ;;  %v295_v2 = vld [vmem:[%s234_s23] sm:$0xff]  ;;  %v1008_v3 = vld [vmem:[%s243_s8] sm:$0xff]  ;;  %s559_s25 = sshll.u32 %s843_s19, 7 }
  0x75   : > { %v297_v0 = vld [vmem:[%s252_s22] sm:$0xff]  ;;  %v299_v4 = vsub.f32 %v295_v2, %v1008_v3  ;;  %s284_s13 = scalar_lea.vmem [#allocation8], %s993_s11  ;;  %s1025_s10 = scalar_lea.hbm %s1071_s3, %s559_s25 }
  0x76   : > { %v298_v1 = vmax.f32 %v297_v0, 0.11  ;;  %s403_s28 = sshll.u32 %s284_s13, 4  ;;  %s386_s9 = scalar_lea.sflag [#allocation4], %s990_s14  ;;  %s404_s28 = int_to_ptr.vmem [resolvable:$true] %s403_s28 }
  0x77   : > { %v1011_v6 = vround.rtne.f32 %v299_v4  ;;  %s721_s29 = scalar_lea.vmem %s404_s28, 128  ;;  %p1091_p5 = scmp.ne.s32.totalorder %s1080_s26, 0 }
  0x78   : > { %619 = vrcp.f32 %v298_v1  ;;  %p722_p10 = scmp.ne.s32.totalorder %s404_s28, %s721_s29  ;;  %s796_s30 = smov [#allocation8]  }
  0x79   : > { %v303_v9 = vand.u32 2147483647, %v1011_v6  ;;  %s725_s20 = sshll.u32 %s796_s30, 4  ;;  %s726_s20 = int_to_ptr.vmem [resolvable:$false] %s725_s20 }
  0x7a   : > { %p723_p7 = pnand %p722_p10, %p1091_p5  ;;  %s727_s1 = scalar_lea.vmem %s726_s20, 256 }
  0x7b   : > { %vm372_vm0 = vcmp.lt.f32.partialorder %v303_v9, 0.5  ;;  %p728_p6 = scmp.lt.s32.totalorder %s404_s28, %s726_s20  ;;  %p729_p12 = scmp.lt.s32.totalorder %s727_s1, %s721_s29 }
  0x7c   : > { %p724_p9 = pneg %p723_p7 }
  0x7d   : > { %p730_p0 = por %p729_p12, %p728_p6 }
  0x7f   : > { %p731_p8 = pnand %p730_p0, %p724_p9 }
  0x82   : > { %v620_v5 = vpop.eup %619 }
  0x83   : > { %v305_v7 = vmul.f32 %v620_v5, %v298_v1 }
  0x85   : > { %v306_v8 = vsub.f32 2.0, %v305_v7 }
  0x87   : > { %v307_v10 = vmul.f32 %v620_v5, %v306_v8 }
  0x89   : > { %v308_v11 = vmul.f32 0.70710677, %v307_v10 }
  0x8b   : > { %v309_v12 = vmul.f32 0.5, %v308_v11  ;;  %v310_v13 = vmul.f32 %v308_v11, %v303_v9 }
  0x8d   : > { %v311_v14 = vsub.f32 %v310_v13, %v309_v12  ;;  %v342_v15 = vadd.f32 %v310_v13, %v309_v12 }
  0x8f   : > { %v312_v16 = vand.u32 2147483647, %v311_v14  ;;  %v343_v17 = vmul.f32 0.5, %v342_v15  ;;  %v367_v62 = vmul.f32 %v342_v15, %v342_v15 }
  0x91   : > { %v313_v18 = vmul.f32 0.5, %v312_v16  ;;  %v344_v19 = vadd.f32 1.0, %v343_v17  ;;  %v337_v0 = vmul.f32 %v312_v16, %v312_v16 }
  0x93   : > { %v314_v20 = vadd.f32 1.0, %v313_v18  ;;  %621 = vrcp.f32 %v344_v19 }
  0x95   : > { %623 = vrcp.f32 %v314_v20 }
  0x9d   : > { %v622_v21 = vpop.eup %621 }
  0x9e   : > { %v346_v22 = vmul.f32 %v622_v21, %v344_v19 }
  0x9f   : > { %v624_v23 = vpop.eup %623 }
  0xa0   : > { %v316_v24 = vmul.f32 %v624_v23, %v314_v20  ;;  %v347_v25 = vsub.f32 2.0, %v346_v22 }
  0xa2   : > { %v317_v26 = vsub.f32 2.0, %v316_v24  ;;  %v348_v27 = vmul.f32 %v622_v21, %v347_v25  ;;  %v301_v21 = vadd.f32 %v1011_v6, %v1008_v3 }
  0xa4   : > { %v318_v28 = vmul.f32 %v624_v23, %v317_v26  ;;  %v349_v29 = vmul.f32 0.17087276, %v348_v27  ;;  %302 = vst [vmem:[%s284_s13] sm:$0xff] %v301_v21 }
  0xa6   : > { %v319_v30 = vmul.f32 0.17087276, %v318_v28  ;;  %v350_v31 = vadd.f32 -0.82215226, %v349_v29 }
  0xa8   : > { %v320_v32 = vadd.f32 -0.82215226, %v319_v30  ;;  %v351_v33 = vmul.f32 %v350_v31, %v348_v27 }
  0xaa   : > { %v321_v34 = vmul.f32 %v320_v32, %v318_v28  ;;  %v352_v35 = vadd.f32 1.4885159, %v351_v33 }
  0xac   : > { %v322_v36 = vadd.f32 1.4885159, %v321_v34  ;;  %v353_v37 = vmul.f32 %v352_v35, %v348_v27 }
  0xae   : > { %v323_v38 = vmul.f32 %v322_v36, %v318_v28  ;;  %v354_v39 = vadd.f32 -1.135204, %v353_v37 }
  0xb0   : > { %v324_v40 = vadd.f32 -1.135204, %v323_v38  ;;  %v355_v41 = vmul.f32 %v354_v39, %v348_v27 }
  0xb2   : > { %v325_v42 = vmul.f32 %v324_v40, %v318_v28  ;;  %v356_v43 = vadd.f32 0.27886808, %v355_v41 }
  0xb4   : > { %v326_v44 = vadd.f32 0.27886808, %v325_v42  ;;  %v357_v45 = vmul.f32 %v356_v43, %v348_v27 }
  0xb6   : > { %v327_v46 = vmul.f32 %v326_v44, %v318_v28  ;;  %v358_v47 = vadd.f32 -0.18628806, %v357_v45 }
  0xb8   : > { %v328_v48 = vadd.f32 -0.18628806, %v327_v46  ;;  %v359_v49 = vmul.f32 %v358_v47, %v348_v27 }
  0xba   : > { %v329_v50 = vmul.f32 %v328_v48, %v318_v28  ;;  %v360_v51 = vadd.f32 0.09678418, %v359_v49 }
  0xbc   : > { %v330_v52 = vadd.f32 0.09678418, %v329_v50  ;;  %v361_v53 = vmul.f32 %v360_v51, %v348_v27 }
  0xbe   : > { %v331_v54 = vmul.f32 %v330_v52, %v318_v28  ;;  %v362_v55 = vadd.f32 0.37409195, %v361_v53 }
  0xc0   : > { %v332_v56 = vadd.f32 0.37409195, %v331_v54  ;;  %v363_v57 = vmul.f32 %v362_v55, %v348_v27 }
  0xc2   : > { %v333_v58 = vmul.f32 %v332_v56, %v318_v28  ;;  %v364_v59 = vadd.f32 1.0000237, %v363_v57 }
  0xc4   : > { %v334_v60 = vadd.f32 1.0000237, %v333_v58  ;;  %v365_v61 = vmul.f32 %v364_v59, %v348_v27 }
  0xc6   : > { %v335_v63 = vmul.f32 %v334_v60, %v318_v28  ;;  %v366_v1 = vadd.f32 -1.9586594, %v365_v61 }
  0xc8   : > { %v336_v2 = vadd.f32 -1.9586594, %v335_v63  ;;  %v368_v4 = vsub.f32 %v366_v1, %v367_v62 }
  0xca   : > { %v338_v5 = vsub.f32 %v336_v2, %v337_v0  ;;  %v369_v7 = vmul.f32 1.442695, %v368_v4 }
  0xcc   : > { %v339_v8 = vmul.f32 1.442695, %v338_v5  ;;  %625 = vpow2.f32 %v369_v7 }
  0xce   : > { %627 = vpow2.f32 %v339_v8 }
  0xd6   : > { %v626_v10 = vpop.eup %625 }
  0xd7   : > { %v371_v11 = vmul.f32 %v626_v10, %v348_v27 }
  0xd8   : > { %v628_v12 = vpop.eup %627 }
  0xd9   : > { %v341_v13 = vmul.f32 %v628_v12, %v318_v28  ;;  %v373_v14 = vadd.f32 %v371_v11, %v371_v11 }
  0xdb   : > { %v374_v15 = vsub.f32 1.0, %v373_v14  ;;  %v375_v16 = vsub.f32 %v341_v13, %v371_v11 }
  0xdd   : > { %v376_v17 = vsel %vm372_vm0, %v374_v15, %v375_v16 }
  0xde   : > { %v377_v18 = vmax.f32 %v376_v17, 1e-09 }
  0xe0   : > { %629 = vlog2.f32 %v377_v18 }
  0xea   : > { %v630_v19 = vpop.eup %629 }
  0xeb   : > { %v379_v20 = vmul.f32 0.6931472, %v630_v19 }
  0xed   : > { %380 = vadd.xlane.f32.xlu0 %v379_v20 }
  0xee   : > { %734 = shalt.err (!%p731_p8)
}
  0xef   : > { %s735_s14 = scalar_lea.hbm %s1025_s10, 128  ;;  %s739_s23 = scalar_lea.hbm %s1071_s3, 256 }
  0xf0   : > { %p736_p13 = scmp.ne.s32.totalorder %s1025_s10, %s735_s14  ;;  %p740_p3 = scmp.lt.u32.totalorder %s1025_s10, %s1071_s3 }
  0xf1   : > { %p741_p4 = scmp.lt.u32.totalorder %s739_s23, %s735_s14  ;;  %p743_p10 = scmp.lt.u32.totalorder %s735_s14, %s1025_s10 }
  0xf2   : > { %p737_p11 = pnand %p736_p13, %p1091_p5 }
  0xf3   : > { %p742_p2 = por %p741_p4, %p740_p3 }
  0xf4   : > { %p738_p1 = pneg %p737_p11 }
  0xf5   : > { %p744_p7 = por %p743_p10, %p742_p2 }
  0xf7   : > { %p745_p9 = pnand %p744_p7, %p738_p1 }
  0xf9   : > { %748 = shalt.err (!%p745_p9)
}
  0xfa   : > { %569 = dma.vmem_to_hbm [thread:$0]  (%p1091_p5), %s404_s28, 128, %s1025_s10, %s386_s9   ;;  %vm383_vm1 = vcmask 7168  }
  0xfb   : > { %p291_p6 = scmp.lt.s32.totalorder %s843_s19, 1 }
  0xfd   : > { %s1100_s19 = smov (!%p291_p6, %s843_s19), 1 }
  0xfe   : > { %s557_s8 = sshll.u32 %s1100_s19, 3 }
  0xff   : > { %s294_s13 = scalar_lea.vmem %s1072_s4, %s557_s8 }
 0x17a   : > { %v381_v3 = vpop.xlane.xlu0 %380 }
 0x17b   : > { %v382_v6 = vmul.f32 -1.442695, %v381_v3 }
 0x17d   : > { %384 = vst.msk [vmem:[%s294_s13] sm:$0xff] %vm383_vm1, %v382_v6 }
 0x17e PF: > { %s418_s26 = sand.u32 1, %s779_s15   ;;  %p1092_p12 = scmp.ne.s32.totalorder %s1081_s27, 0 }
 0x17f   : > { %p1093_p0 = scmp.ge.s32.totalorder %s791_s18, 2  ;;  %s419_s28 = scalar_lea.sflag [#allocation4], %s418_s26 }
 0x181   : > { %p582_p8 = pnand %p1093_p0, %p1092_p12 }
 0x183   : > { %774 = dma.done.wait (!%p582_p8), %s419_s28, 128  }
 0x184   : > { %776 = vsyncadd (!%p582_p8), %s419_s28, 4294967168  ;;  %s1094_s19 = sld [smem:[#allocation12_spill]]  ;;  %p21_p5 = scmp.ge.s32.totalorder %s847_s21, 4  }
 0x185   : > { %s1095_s15 = smov %s783_s16  ;;  %s1096_s16 = smov %s787_s17 }
 0x186   : > { %s1098_s18 = smov %s847_s21  ;;  %23 = sbr.rel (!%p21_p5) target bundleno = 9 (0x9), region = 113 }
 0x18a   : > { %s1097_s17 = smov %s1094_s19 }
 0x18d   :  { %431 = vsyncpa [#allocation3], 1 }
 0x18e   :  { %433 = vsyncpa [#allocation3 + $0x1], 1 }
 0x18f   :  { %434 = vsyncpa [#allocation6], 1 }
 0x190   :  { %436 = vsyncpa [#allocation6 + $0x1], 1 }
 0x191   :  { %437 = vsyncpa [#allocation4], 1 }
 0x192   :  { %439 = vsyncpa [#allocation4 + $0x1], 1 }

</bundles_post_ra>
